<compile_context>
chip_gen: v6e
topology: v6e:2x2x1
jax: 0.10.0
libtpu: 0.0.40
codegen_flags: <defaults>
</compile_context>

<pallas_src>
import numpy as np
import jax
import jax.numpy as jnp
from jax import lax
from jax.experimental import pallas as pl
from jax.experimental.pallas import tpu as pltpu


def _round_up(x: int, m: int) -> int:
    return (x + m - 1) // m * m


# --------------------------------------------------------------------------
# Phase 1: class prototypes = (mask @ eeg) * inv_counts, accumulated over B.
# --------------------------------------------------------------------------
def _proto_kernel(mask_ref, eeg_ref, inv_counts_ref, protos_ref):
    b = pl.program_id(0)

    @pl.when(b == 0)
    def _init():
        protos_ref[...] = jnp.zeros_like(protos_ref)

    # (U, tb) @ (tb, D) -> (U, D); contraction is lhs dim 1 vs rhs dim 0,
    # i.e. no operand transpose needed on the MXU path.
    protos_ref[...] += lax.dot_general(
        mask_ref[...], eeg_ref[...],
        dimension_numbers=(((1,), (0,)), ((), ())),
        preferred_element_type=jnp.float32)

    @pl.when(b == pl.num_programs(0) - 1)
    def _finalize():
        protos_ref[...] = protos_ref[...] * inv_counts_ref[...]


# --------------------------------------------------------------------------
# Phase 2: per-class distance statistics + final loss, accumulated over B.
# --------------------------------------------------------------------------
def _geo_var_kernel(protos_ref, mask_ref, imgT_ref, isq_ref, inv_counts_ref,
                    out_ref, psq_sc, sumd_sc, sumd2_sc):
    b = pl.program_id(0)

    @pl.when(b == 0)
    def _init():
        protos = protos_ref[...]
        psq_sc[...] = jnp.sum(protos * protos, axis=1, keepdims=True)  # (U,1)
        sumd_sc[...] = jnp.zeros_like(sumd_sc)
        sumd2_sc[...] = jnp.zeros_like(sumd2_sc)

    mask = mask_ref[...]                                              # (U, tb)

    # (U, D) @ (D, tb) -> (U, tb); image features arrive pre-transposed so
    # the contraction is lhs dim 1 vs rhs dim 0 (no in-kernel transpose).
    cross = lax.dot_general(
        protos_ref[...], imgT_ref[...],
        dimension_numbers=(((1,), (0,)), ((), ())),
        preferred_element_type=jnp.float32)

    d2 = psq_sc[...] + isq_ref[...] - 2.0 * cross                     # (U, tb)
    dist = jnp.sqrt(jnp.maximum(d2, 0.0))

    md = dist * mask                                                  # mask is 0/1
    sumd_sc[...] += jnp.sum(md, axis=1, keepdims=True)                # sum mask*d
    sumd2_sc[...] += jnp.sum(md * dist, axis=1, keepdims=True)        # sum mask*d^2

    @pl.when(b == pl.num_programs(0) - 1)
    def _finalize():
        inv_c = inv_counts_ref[...]                                   # exact 1/count
        mean = sumd_sc[...] * inv_c
        var = sumd2_sc[...] * inv_c - mean * mean                     # (U, 1)
        # Single-member / empty / padded classes give var == 0 exactly, so the
        # non_zero count matches the reference's count_nonzero over unique().
        non_zero = jnp.sum((var != 0.0).astype(jnp.float32)) + 0.0001
        loss = jnp.sum(var) / non_zero          # one scalar divide, kept exact
        out_ref[...] = jnp.full((1, 1), loss, dtype=out_ref.dtype)


# --------------------------------------------------------------------------
# Wrapper (fully jit-compatible; num_classes is static).
# --------------------------------------------------------------------------
def intra_geometry_variance(image_features, eeg_features, labels,
                            num_classes, block_b=512):
    img = jnp.asarray(image_features, dtype=jnp.float32)
    eeg = jnp.asarray(eeg_features, dtype=jnp.float32)
    labels = jnp.asarray(labels).astype(jnp.int32)

    B, D = img.shape
    U = int(num_classes)

    # One-hot class mask (U, B) built on-device: no host sync, no recompiles.
    mask = (jnp.arange(U, dtype=jnp.int32)[:, None] == labels[None, :]
            ).astype(jnp.float32)

    # Padding: U -> mult of 8 (sublanes), D / B-tile -> mult of 128 (lanes).
    U_pad = _round_up(max(U, 8), 8)
    D_pad = _round_up(max(D, 128), 128)
    tb = _round_up(min(int(block_b), _round_up(max(B, 128), 128)), 128)
    B_pad = _round_up(max(B, tb), tb)
    nb = B_pad // tb

    mask_p = jnp.pad(mask, ((0, U_pad - U), (0, B_pad - B)))
    img_p = jnp.pad(img, ((0, B_pad - B), (0, D_pad - D)))
    eeg_p = jnp.pad(eeg, ((0, B_pad - B), (0, D_pad - D)))

    # Exact reciprocal of (clamped) class counts, reused as multiplies in-kernel.
    counts = jnp.sum(mask_p, axis=1, keepdims=True)                   # (U_pad, 1)
    inv_counts = 1.0 / jnp.maximum(counts, 1.0)

    # Layout plumbing hoisted out of the kernel.
    img_T = img_p.T                                                   # (D_pad, B_pad)
    i_sq = jnp.sum(img_p * img_p, axis=1)[None, :]                    # (1, B_pad)

    # Phase 1: prototypes.
    protos = pl.pallas_call(
        _proto_kernel,
        out_shape=jax.ShapeDtypeStruct((U_pad, D_pad), jnp.float32),
        grid=(nb,),
        in_specs=[
            pl.BlockSpec((U_pad, tb), lambda b: (0, b)),      # mask tile
            pl.BlockSpec((tb, D_pad), lambda b: (b, 0)),      # eeg tile
            pl.BlockSpec((U_pad, 1), lambda b: (0, 0)),       # inv_counts (resident)
        ],
        out_specs=pl.BlockSpec((U_pad, D_pad), lambda b: (0, 0)),
        compiler_params=pltpu.CompilerParams(
            dimension_semantics=("arbitrary",)),
    )(mask_p, eeg_p, inv_counts)

    # Phase 2: distances, per-class variance, loss.
    out = pl.pallas_call(
        _geo_var_kernel,
        out_shape=jax.ShapeDtypeStruct((1, 1), jnp.float32),
        grid=(nb,),
        in_specs=[
            pl.BlockSpec((U_pad, D_pad), lambda b: (0, 0)),   # prototypes (resident)
            pl.BlockSpec((U_pad, tb), lambda b: (0, b)),      # mask tile
            pl.BlockSpec((D_pad, tb), lambda b: (0, b)),      # img^T tile
            pl.BlockSpec((1, tb), lambda b: (0, b)),          # ||img||^2 tile
            pl.BlockSpec((U_pad, 1), lambda b: (0, 0)),       # inv_counts (resident)
        ],
        out_specs=pl.BlockSpec((1, 1), lambda b: (0, 0)),
        scratch_shapes=[
            pltpu.VMEM((U_pad, 1), jnp.float32),   # ||proto||^2
            pltpu.VMEM((U_pad, 1), jnp.float32),   # sum mask*d
            pltpu.VMEM((U_pad, 1), jnp.float32),   # sum mask*d^2
        ],
        compiler_params=pltpu.CompilerParams(
            dimension_semantics=("arbitrary",)),
    )(protos, mask_p, img_T, i_sq, inv_counts)

    return out[0, 0]


# --------------------------------------------------------------------------
# Plain numpy reference mirroring the PyTorch forward.
# --------------------------------------------------------------------------
def _reference(image_features, eeg_features, labels):
    img = np.asarray(image_features, dtype=np.float64)
    eeg = np.asarray(eeg_features, dtype=np.float64)
    labels_np = np.asarray(labels)
    unique = np.unique(labels_np)
    mask = (unique[:, None] == labels_np[None, :]).astype(np.float64)
    protos = np.stack([eeg[labels_np == u].mean(axis=0) for u in unique], 0)
    dist = np.sqrt(np.maximum(
        ((protos[:, None, :] - img[None, :, :]) ** 2).sum(-1), 0.0))
    cls_dis = dist * mask
    cls_means = cls_dis.sum(1) / mask.sum(1)
    cls_dis = cls_dis + (1 - mask) * cls_means[:, None]
    cls_var = ((cls_dis - cls_means[:, None]) ** 2).sum(1) / mask.sum(1)
    non_zero = np.count_nonzero(cls_var) + 0.0001
    return cls_var.sum() / non_zero


if __name__ == "__main__":
    key = jax.random.PRNGKey(0)
    k_img, k_eeg, k_lab = jax.random.split(key, 3)

    B, D, NUM_CLASSES = 8, 32, 4
    image_features = jax.random.normal(k_img, (B, D), dtype=jnp.float32)
    eeg_features = jax.random.normal(k_eeg, (B, D), dtype=jnp.float32)
    labels = jax.random.randint(k_lab, (B,), 0, NUM_CLASSES, dtype=jnp.int32)

    loss_fn = jax.jit(intra_geometry_variance, static_argnames=("num_classes",))
    loss = loss_fn(image_features, eeg_features, labels, num_classes=NUM_CLASSES)
    loss = jax.block_until_ready(loss)

    ref = _reference(image_features, eeg_features, labels)
    np.testing.assert_allclose(np.asarray(loss), ref, rtol=1e-3, atol=1e-5)

    print("KERNEL_OK")
</pallas_src>

<mosaic_0001>
module attributes {stable_mosaic.version = 11 : i64} {
  func.func @_proto_kernel(%arg0: i32, %arg1: memref<8x128xf32, #tpu.memory_space<vmem>>, %arg2: memref<128x128xf32, #tpu.memory_space<vmem>>, %arg3: memref<8x1xf32, #tpu.memory_space<vmem>>, %arg4: memref<8x128xf32, #tpu.memory_space<vmem>>) attributes {dimension_semantics = [#tpu.dimension_semantics<arbitrary>], iteration_bounds = array<i64: 1>, scalar_prefetch = 0 : i64, scratch_operands = 0 : i64, tpu.core_type = #tpu.core_type<tc>, window_params = [{transform_indices = @transform_0, window_bounds = array<i64: 8, 128>}, {transform_indices = @transform_1, window_bounds = array<i64: 128, 128>}, {pipeline_mode = #tpu.pipeline_mode<synchronous>, transform_indices = @transform_2, window_bounds = array<i64: 8, 1>}, {pipeline_mode = #tpu.pipeline_mode<synchronous>, transform_indices = @transform_3, window_bounds = array<i64: 8, 128>}]} {
    %c0_i32 = arith.constant 0 : i32
    %0 = arith.cmpi eq, %arg0, %c0_i32 : i32
    %1 = arith.extui %0 : i1 to i32
    %c0_i32_0 = arith.constant 0 : i32
    %2 = arith.cmpi ne, %1, %c0_i32_0 : i32
    scf.if %2 {
      %cst_10 = arith.constant 0.000000e+00 : f32
      %12 = vector.broadcast %cst_10 : f32 to vector<8x128xf32>
      %c0_11 = arith.constant 0 : index
      %c0_12 = arith.constant 0 : index
      %13 = vector.load %arg4[%c0_11, %c0_12] : memref<8x128xf32, #tpu.memory_space<vmem>>, vector<8x128xf32>
      tpu.vector_store %arg4[%c0_11, %c0_12], %12 {strides = array<i32>} : memref<8x128xf32, #tpu.memory_space<vmem>>, vector<8x128xf32>,
    } else {
    }
    %c0 = arith.constant 0 : index
    %c0_1 = arith.constant 0 : index
    %3 = vector.load %arg4[%c0, %c0_1] : memref<8x128xf32, #tpu.memory_space<vmem>>, vector<8x128xf32>
    %c0_2 = arith.constant 0 : index
    %c0_3 = arith.constant 0 : index
    %4 = vector.load %arg1[%c0_2, %c0_3] : memref<8x128xf32, #tpu.memory_space<vmem>>, vector<8x128xf32>
    %c0_4 = arith.constant 0 : index
    %c0_5 = arith.constant 0 : index
    %5 = vector.load %arg2[%c0_4, %c0_5] : memref<128x128xf32, #tpu.memory_space<vmem>>, vector<128x128xf32>
    %cst = arith.constant dense<0.000000e+00> : vector<8x128xf32>
    %6 = tpu.matmul %4, %5, %cst {dimension_numbers = #tpu.dot_dimension_numbers<[1], [0], [0], [1], [0, 0, 1, 1], [], []>} : vector<8x128xf32>, vector<128x128xf32>, vector<8x128xf32> -> vector<8x128xf32>
    %7 = arith.addf %3, %6 : vector<8x128xf32>
    %c0_6 = arith.constant 0 : index
    %c0_7 = arith.constant 0 : index
    %8 = vector.load %arg4[%c0_6, %c0_7] : memref<8x128xf32, #tpu.memory_space<vmem>>, vector<8x128xf32>
    tpu.vector_store %arg4[%c0_6, %c0_7], %7 {strides = array<i32>} : memref<8x128xf32, #tpu.memory_space<vmem>>, vector<8x128xf32>,
    %c0_i32_8 = arith.constant 0 : i32
    %9 = arith.cmpi eq, %arg0, %c0_i32_8 : i32
    %10 = arith.extui %9 : i1 to i32
    %c0_i32_9 = arith.constant 0 : i32
    %11 = arith.cmpi ne, %10, %c0_i32_9 : i32
    scf.if %11 {
      %c0_10 = arith.constant 0 : index
      %c0_11 = arith.constant 0 : index
      %12 = vector.load %arg4[%c0_10, %c0_11] : memref<8x128xf32, #tpu.memory_space<vmem>>, vector<8x128xf32>
      %c0_12 = arith.constant 0 : index
      %c0_13 = arith.constant 0 : index
      %13 = vector.load %arg3[%c0_12, %c0_13] : memref<8x1xf32, #tpu.memory_space<vmem>>, vector<8x1xf32>
      %14 = vector.broadcast %13 : vector<8x1xf32> to vector<8x128xf32>
      %15 = arith.mulf %12, %14 : vector<8x128xf32>
      %c0_14 = arith.constant 0 : index
      %c0_15 = arith.constant 0 : index
      %16 = vector.load %arg4[%c0_14, %c0_15] : memref<8x128xf32, #tpu.memory_space<vmem>>, vector<8x128xf32>
      tpu.vector_store %arg4[%c0_14, %c0_15], %15 {strides = array<i32>} : memref<8x128xf32, #tpu.memory_space<vmem>>, vector<8x128xf32>,
    } else {
    }
    return
  }
  func.func @transform_0(%arg0: i32) -> (i32, i32) {
    %c0_i32 = arith.constant 0 : i32
    %c0_i32_0 = arith.constant 0 : i32
    return %c0_i32, %arg0 : i32, i32
  }
  func.func @transform_1(%arg0: i32) -> (i32, i32) {
    %c0_i32 = arith.constant 0 : i32
    %c0_i32_0 = arith.constant 0 : i32
    return %arg0, %c0_i32 : i32, i32
  }
  func.func @transform_2(%arg0: i32) -> (i32, i32) {
    %c0_i32 = arith.constant 0 : i32
    %c0_i32_0 = arith.constant 0 : i32
    %c0_i32_1 = arith.constant 0 : i32
    return %c0_i32, %c0_i32_0 : i32, i32
  }
  func.func @transform_3(%arg0: i32) -> (i32, i32) {
    %c0_i32 = arith.constant 0 : i32
    %c0_i32_0 = arith.constant 0 : i32
    %c0_i32_1 = arith.constant 0 : i32
    return %c0_i32, %c0_i32_0 : i32, i32
  }
}

module attributes {stable_mosaic.version = 11 : i64} {
  func.func @_geo_var_kernel(%arg0: i32, %arg1: memref<8x128xf32, #tpu.memory_space<vmem>>, %arg2: memref<8x128xf32, #tpu.memory_space<vmem>>, %arg3: memref<128x128xf32, #tpu.memory_space<vmem>>, %arg4: memref<1x128xf32, #tpu.memory_space<vmem>>, %arg5: memref<8x1xf32, #tpu.memory_space<vmem>>, %arg6: memref<1x1xf32, #tpu.memory_space<vmem>>, %arg7: memref<8x1xf32, #tpu.memory_space<vmem>>, %arg8: memref<8x1xf32, #tpu.memory_space<vmem>>, %arg9: memref<8x1xf32, #tpu.memory_space<vmem>>) attributes {dimension_semantics = [#tpu.dimension_semantics<arbitrary>], iteration_bounds = array<i64: 1>, scalar_prefetch = 0 : i64, scratch_operands = 3 : i64, tpu.core_type = #tpu.core_type<tc>, window_params = [{pipeline_mode = #tpu.pipeline_mode<synchronous>, transform_indices = @transform_0, window_bounds = array<i64: 8, 128>}, {transform_indices = @transform_1, window_bounds = array<i64: 8, 128>}, {transform_indices = @transform_2, window_bounds = array<i64: 128, 128>}, {transform_indices = @transform_3, window_bounds = array<i64: 1, 128>}, {pipeline_mode = #tpu.pipeline_mode<synchronous>, transform_indices = @transform_4, window_bounds = array<i64: 8, 1>}, {pipeline_mode = #tpu.pipeline_mode<synchronous>, transform_indices = @transform_5, window_bounds = array<i64: 1, 1>}]} {
    %c0_i32 = arith.constant 0 : i32
    %0 = arith.cmpi eq, %arg0, %c0_i32 : i32
    %1 = arith.extui %0 : i1 to i32
    %c0_i32_0 = arith.constant 0 : i32
    %2 = arith.cmpi ne, %1, %c0_i32_0 : i32
    scf.if %2 {
      %c0_24 = arith.constant 0 : index
      %c0_25 = arith.constant 0 : index
      %33 = vector.load %arg1[%c0_24, %c0_25] : memref<8x128xf32, #tpu.memory_space<vmem>>, vector<8x128xf32>
      %34 = arith.mulf %33, %33 : vector<8x128xf32>
      %cst_26 = arith.constant dense<0.000000e+00> : vector<8xf32>
      %35 = vector.multi_reduction <add>, %34, %cst_26 [1] : vector<8x128xf32> to vector<8xf32>
      %36 = vector.shape_cast %35 : vector<8xf32> to vector<8x1xf32>
      %c0_27 = arith.constant 0 : index
      %c0_28 = arith.constant 0 : index
      %37 = vector.load %arg7[%c0_27, %c0_28] : memref<8x1xf32, #tpu.memory_space<vmem>>, vector<8x1xf32>
      tpu.vector_store %arg7[%c0_27, %c0_28], %36 {strides = array<i32>} : memref<8x1xf32, #tpu.memory_space<vmem>>, vector<8x1xf32>,
      %cst_29 = arith.constant 0.000000e+00 : f32
      %38 = vector.broadcast %cst_29 : f32 to vector<8x1xf32>
      %c0_30 = arith.constant 0 : index
      %c0_31 = arith.constant 0 : index
      %39 = vector.load %arg8[%c0_30, %c0_31] : memref<8x1xf32, #tpu.memory_space<vmem>>, vector<8x1xf32>
      tpu.vector_store %arg8[%c0_30, %c0_31], %38 {strides = array<i32>} : memref<8x1xf32, #tpu.memory_space<vmem>>, vector<8x1xf32>,
      %cst_32 = arith.constant 0.000000e+00 : f32
      %40 = vector.broadcast %cst_32 : f32 to vector<8x1xf32>
      %c0_33 = arith.constant 0 : index
      %c0_34 = arith.constant 0 : index
      %41 = vector.load %arg9[%c0_33, %c0_34] : memref<8x1xf32, #tpu.memory_space<vmem>>, vector<8x1xf32>
      tpu.vector_store %arg9[%c0_33, %c0_34], %40 {strides = array<i32>} : memref<8x1xf32, #tpu.memory_space<vmem>>, vector<8x1xf32>,
    } else {
    }
    %c0 = arith.constant 0 : index
    %c0_1 = arith.constant 0 : index
    %3 = vector.load %arg2[%c0, %c0_1] : memref<8x128xf32, #tpu.memory_space<vmem>>, vector<8x128xf32>
    %c0_2 = arith.constant 0 : index
    %c0_3 = arith.constant 0 : index
    %4 = vector.load %arg1[%c0_2, %c0_3] : memref<8x128xf32, #tpu.memory_space<vmem>>, vector<8x128xf32>
    %c0_4 = arith.constant 0 : index
    %c0_5 = arith.constant 0 : index
    %5 = vector.load %arg3[%c0_4, %c0_5] : memref<128x128xf32, #tpu.memory_space<vmem>>, vector<128x128xf32>
    %cst = arith.constant dense<0.000000e+00> : vector<8x128xf32>
    %6 = tpu.matmul %4, %5, %cst {dimension_numbers = #tpu.dot_dimension_numbers<[1], [0], [0], [1], [0, 0, 1, 1], [], []>} : vector<8x128xf32>, vector<128x128xf32>, vector<8x128xf32> -> vector<8x128xf32>
    %c0_6 = arith.constant 0 : index
    %c0_7 = arith.constant 0 : index
    %7 = vector.load %arg7[%c0_6, %c0_7] : memref<8x1xf32, #tpu.memory_space<vmem>>, vector<8x1xf32>
    %c0_8 = arith.constant 0 : index
    %c0_9 = arith.constant 0 : index
    %8 = vector.load %arg4[%c0_8, %c0_9] : memref<1x128xf32, #tpu.memory_space<vmem>>, vector<1x128xf32>
    %9 = vector.broadcast %7 : vector<8x1xf32> to vector<8x128xf32>
    %10 = vector.broadcast %8 : vector<1x128xf32> to vector<8x128xf32>
    %11 = arith.addf %9, %10 : vector<8x128xf32>
    %cst_10 = arith.constant 2.000000e+00 : f32
    %12 = vector.broadcast %cst_10 : f32 to vector<8x128xf32>
    %13 = arith.mulf %12, %6 : vector<8x128xf32>
    %14 = arith.subf %11, %13 : vector<8x128xf32>
    %cst_11 = arith.constant 0.000000e+00 : f32
    %15 = vector.broadcast %cst_11 : f32 to vector<8x128xf32>
    %16 = arith.maximumf %14, %15 : vector<8x128xf32>
    %17 = math.sqrt %16 : vector<8x128xf32>
    %18 = arith.mulf %17, %3 : vector<8x128xf32>
    %c0_12 = arith.constant 0 : index
    %c0_13 = arith.constant 0 : index
    %19 = vector.load %arg8[%c0_12, %c0_13] : memref<8x1xf32, #tpu.memory_space<vmem>>, vector<8x1xf32>
    %cst_14 = arith.constant dense<0.000000e+00> : vector<8xf32>
    %20 = vector.multi_reduction <add>, %18, %cst_14 [1] : vector<8x128xf32> to vector<8xf32>
    %21 = vector.shape_cast %20 : vector<8xf32> to vector<8x1xf32>
    %22 = arith.addf %19, %21 : vector<8x1xf32>
    %c0_15 = arith.constant 0 : index
    %c0_16 = arith.constant 0 : index
    %23 = vector.load %arg8[%c0_15, %c0_16] : memref<8x1xf32, #tpu.memory_space<vmem>>, vector<8x1xf32>
    tpu.vector_store %arg8[%c0_15, %c0_16], %22 {strides = array<i32>} : memref<8x1xf32, #tpu.memory_space<vmem>>, vector<8x1xf32>,
    %c0_17 = arith.constant 0 : index
    %c0_18 = arith.constant 0 : index
    %24 = vector.load %arg9[%c0_17, %c0_18] : memref<8x1xf32, #tpu.memory_space<vmem>>, vector<8x1xf32>
    %25 = arith.mulf %18, %17 : vector<8x128xf32>
    %cst_19 = arith.constant dense<0.000000e+00> : vector<8xf32>
    %26 = vector.multi_reduction <add>, %25, %cst_19 [1] : vector<8x128xf32> to vector<8xf32>
    %27 = vector.shape_cast %26 : vector<8xf32> to vector<8x1xf32>
    %28 = arith.addf %24, %27 : vector<8x1xf32>
    %c0_20 = arith.constant 0 : index
    %c0_21 = arith.constant 0 : index
    %29 = vector.load %arg9[%c0_20, %c0_21] : memref<8x1xf32, #tpu.memory_space<vmem>>, vector<8x1xf32>
    tpu.vector_store %arg9[%c0_20, %c0_21], %28 {strides = array<i32>} : memref<8x1xf32, #tpu.memory_space<vmem>>, vector<8x1xf32>,
    %c0_i32_22 = arith.constant 0 : i32
    %30 = arith.cmpi eq, %arg0, %c0_i32_22 : i32
    %31 = arith.extui %30 : i1 to i32
    %c0_i32_23 = arith.constant 0 : i32
    %32 = arith.cmpi ne, %31, %c0_i32_23 : i32
    scf.if %32 {
      %c0_24 = arith.constant 0 : index
      %c0_25 = arith.constant 0 : index
      %33 = vector.load %arg5[%c0_24, %c0_25] : memref<8x1xf32, #tpu.memory_space<vmem>>, vector<8x1xf32>
      %c0_26 = arith.constant 0 : index
      %c0_27 = arith.constant 0 : index
      %34 = vector.load %arg8[%c0_26, %c0_27] : memref<8x1xf32, #tpu.memory_space<vmem>>, vector<8x1xf32>
      %35 = arith.mulf %34, %33 : vector<8x1xf32>
      %c0_28 = arith.constant 0 : index
      %c0_29 = arith.constant 0 : index
      %36 = vector.load %arg9[%c0_28, %c0_29] : memref<8x1xf32, #tpu.memory_space<vmem>>, vector<8x1xf32>
      %37 = arith.mulf %36, %33 : vector<8x1xf32>
      %38 = arith.mulf %35, %35 : vector<8x1xf32>
      %39 = arith.subf %37, %38 : vector<8x1xf32>
      %cst_30 = arith.constant 0.000000e+00 : f32
      %40 = vector.broadcast %cst_30 : f32 to vector<8x1xf32>
      %41 = arith.cmpf one, %39, %40 : vector<8x1xf32>
      %42 = arith.extui %41 : vector<8x1xi1> to vector<8x1xi32>
      %43 = arith.sitofp %42 : vector<8x1xi32> to vector<8x1xf32>
      %44 = vector.shape_cast %43 : vector<8x1xf32> to vector<1x8x1xf32>
      %cst_31 = arith.constant dense<0.000000e+00> : vector<1xf32>
      %45 = vector.multi_reduction <add>, %44, %cst_31 [1, 2] : vector<1x8x1xf32> to vector<1xf32>
      %46 = vector.shape_cast %45 : vector<1xf32> to vector<1x1x1xf32>
      %47 = vector.extract %46[0, 0, 0] : f32 from vector<1x1x1xf32>
      %cst_32 = arith.constant 9.99999974E-5 : f32
      %48 = arith.addf %47, %cst_32 : f32
      %49 = vector.shape_cast %39 : vector<8x1xf32> to vector<1x8x1xf32>
      %cst_33 = arith.constant dense<0.000000e+00> : vector<1xf32>
      %50 = vector.multi_reduction <add>, %49, %cst_33 [1, 2] : vector<1x8x1xf32> to vector<1xf32>
      %51 = vector.shape_cast %50 : vector<1xf32> to vector<1x1x1xf32>
      %52 = vector.extract %51[0, 0, 0] : f32 from vector<1x1x1xf32>
      %53 = arith.divf %52, %48 : f32
      %54 = vector.broadcast %53 : f32 to vector<1x1xf32>
      %c0_34 = arith.constant 0 : index
      %c0_35 = arith.constant 0 : index
      %55 = vector.load %arg6[%c0_34, %c0_35] : memref<1x1xf32, #tpu.memory_space<vmem>>, vector<1x1xf32>
      tpu.vector_store %arg6[%c0_34, %c0_35], %54 {strides = array<i32>} : memref<1x1xf32, #tpu.memory_space<vmem>>, vector<1x1xf32>,
    } else {
    }
    return
  }
  func.func @transform_0(%arg0: i32) -> (i32, i32) {
    %c0_i32 = arith.constant 0 : i32
    %c0_i32_0 = arith.constant 0 : i32
    %c0_i32_1 = arith.constant 0 : i32
    return %c0_i32, %c0_i32_0 : i32, i32
  }
  func.func @transform_1(%arg0: i32) -> (i32, i32) {
    %c0_i32 = arith.constant 0 : i32
    %c0_i32_0 = arith.constant 0 : i32
    return %c0_i32, %arg0 : i32, i32
  }
  func.func @transform_2(%arg0: i32) -> (i32, i32) {
    %c0_i32 = arith.constant 0 : i32
    %c0_i32_0 = arith.constant 0 : i32
    return %c0_i32, %arg0 : i32, i32
  }
  func.func @transform_3(%arg0: i32) -> (i32, i32) {
    %c0_i32 = arith.constant 0 : i32
    %c0_i32_0 = arith.constant 0 : i32
    return %c0_i32, %arg0 : i32, i32
  }
  func.func @transform_4(%arg0: i32) -> (i32, i32) {
    %c0_i32 = arith.constant 0 : i32
    %c0_i32_0 = arith.constant 0 : i32
    %c0_i32_1 = arith.constant 0 : i32
    return %c0_i32, %c0_i32_0 : i32, i32
  }
  func.func @transform_5(%arg0: i32) -> (i32, i32) {
    %c0_i32 = arith.constant 0 : i32
    %c0_i32_0 = arith.constant 0 : i32
    %c0_i32_1 = arith.constant 0 : i32
    return %c0_i32, %c0_i32_0 : i32, i32
  }
}

</mosaic_0001>

<bundles_post_ra>
// kernel: intra_geometry_variance.2
= control target key start
LH: loop header
LB: loop body
LE: loop exit
PB: predicated region body
PF: predicated region fallthrough
CT: control target
= control target key end

     0   :  { %v181_v0 = vmov 0.0   ;;  %vm182_vm0 = vmmov 0   ;;  %v183_v3 = vmov 0   ;;  %s261_s1 = inlined_call_operand.vmem [shape: f32[128,128], index: 1, kind: input, shape index: {}]   ;;  %s262_s2 = inlined_call_operand.vmem [shape: f32[8,1], index: 2, kind: input, shape index: {}]   ;;  %s263_s0 = inlined_call_operand.vmem [shape: f32[8,128], index: 0, kind: input, shape index: {}]   ;;  %s264_s3 = inlined_call_operand.vmem [shape: f32[8,128], index: 3, kind: output, shape index: {}]  }
   0x1   :  { %142 = vmatprep.subr.mxu0 %v181_v0  ;;  %v36_v1 = vld [vmem:[%s261_s1 + $0x78] sm:$0xff]  ;;  %v35_v2 = vld [vmem:[%s261_s1 + $0x70] sm:$0xff]  ;;  %174 = vmatprep.mubr.msk.f32.mxu0 %vm182_vm0, %v181_v0  ;;  %v34_v4 = vld [vmem:[%s261_s1 + $0x68] sm:$0xff] }
   0x2   :  { %143 = vmatpush3.msra.mxu0 %v36_v1  ;;  %180 = vset.pattern.permute.xlu0 %v183_v3  ;;  %v33_v5 = vld [vmem:[%s261_s1 + $0x60] sm:$0xff]  ;;  %v32_v7 = vld [vmem:[%s261_s1 + $0x58] sm:$0xff]  ;;  %v31_v8 = vld [vmem:[%s261_s1 + $0x50] sm:$0xff] }
   0x3   :  { %144 = vmatprep.subr.mxu0 %v181_v0  ;;  %v113_v6 = vld [vmem:[%s262_s2] sm:$0xff]  ;;  %v30_v9 = vld [vmem:[%s261_s1 + $0x48] sm:$0xff]  ;;  %v28_v11 = vld [vmem:[%s261_s1 + $0x38] sm:$0xff] }
   0x4   :  { %145 = vmatpush3.msra.mxu0 %v35_v2  ;;  %116 = vperm.xlu0 %180, %v113_v6   ;;  %v29_v10 = vld [vmem:[%s261_s1 + $0x40] sm:$0xff]  ;;  %v27_v12 = vld [vmem:[%s261_s1 + $0x30] sm:$0xff]  ;;  %v26_v13 = vld [vmem:[%s261_s1 + $0x28] sm:$0xff] }
   0x5   :  { %146 = vmatprep.subr.mxu0 %v181_v0  ;;  %v25_v14 = vld [vmem:[%s261_s1 + $0x20] sm:$0xff]  ;;  %v24_v15 = vld [vmem:[%s261_s1 + $0x18] sm:$0xff]  ;;  %v23_v16 = vld [vmem:[%s261_s1 + $0x10] sm:$0xff] }
   0x6   :  { %147 = vmatpush3.msra.mxu0 %v34_v4  ;;  %v22_v17 = vld [vmem:[%s261_s1 + $0x8] sm:$0xff]  ;;  %v21_v18 = vld [vmem:[%s261_s1] sm:$0xff] }
   0x7   :  { %148 = vmatprep.subr.mxu0 %v181_v0  ;;  %v20_v19 = vld [vmem:[%s263_s0] sm:$0xff] }
   0x8   :  { %149 = vmatpush3.msra.mxu0 %v33_v5 }
   0x9   :  { %150 = vmatprep.subr.mxu0 %v181_v0 }
   0xa   :  { %151 = vmatpush3.msra.mxu0 %v32_v7 }
   0xb   :  { %152 = vmatprep.subr.mxu0 %v181_v0 }
   0xc   :  { %153 = vmatpush3.msra.mxu0 %v31_v8 }
   0xd   :  { %154 = vmatprep.subr.mxu0 %v181_v0 }
   0xe   :  { %155 = vmatpush3.msra.mxu0 %v30_v9 }
   0xf   :  { %156 = vmatprep.subr.mxu0 %v181_v0 }
  0x10   :  { %157 = vmatpush3.msra.mxu0 %v29_v10 }
  0x11   :  { %158 = vmatprep.subr.mxu0 %v181_v0 }
  0x12   :  { %159 = vmatpush3.msra.mxu0 %v28_v11 }
  0x13   :  { %160 = vmatprep.subr.mxu0 %v181_v0 }
  0x14   :  { %161 = vmatpush3.msra.mxu0 %v27_v12 }
  0x15   :  { %162 = vmatprep.subr.mxu0 %v181_v0 }
  0x16   :  { %163 = vmatpush3.msra.mxu0 %v26_v13 }
  0x17   :  { %164 = vmatprep.subr.mxu0 %v181_v0 }
  0x18   :  { %165 = vmatpush3.msra.mxu0 %v25_v14 }
  0x19   :  { %166 = vmatprep.subr.mxu0 %v181_v0 }
  0x1a   :  { %167 = vmatpush3.msra.mxu0 %v24_v15 }
  0x1b   :  { %168 = vmatprep.subr.mxu0 %v181_v0 }
  0x1c   :  { %169 = vmatpush3.msra.mxu0 %v23_v16 }
  0x1d   :  { %170 = vmatprep.subr.mxu0 %v181_v0 }
  0x1e   :  { %171 = vmatpush3.msra.mxu0 %v22_v17 }
  0x1f   :  { %172 = vmatprep.subr.mxu0 %v181_v0 }
  0x20   :  { %173 = vmatpush3.msra.mxu0 %v21_v18 }
  0x21   :  { %175 = vmatmul.mubr.f32.vlgmr.msra.gmra.mxu0 %v20_v19 }
  0x7f   :  { %v117_v21 = vpop.permute.xlu0 %116 }
  0xe1   :  { %v103_v20 = vpop.f32.mrf.mxu0 }
  0xe2   :  { %v119_v23 = vmul.f32 %v117_v21, %v103_v20 }
  0xe3   :  { %v176_v22 = vpop.f32.mrf.mxu0 }
  0xe4   :  { %120 = vst [vmem:[%s264_s3] sm:$0xff] %v119_v23 }

// kernel: intra_geometry_variance.3
= control target key start
LH: loop header
LB: loop body
LE: loop exit
PB: predicated region body
PF: predicated region fallthrough
CT: control target
= control target key end

     0   :  { %vm29_vm0 = vcmask 7168   ;;  %v304_v3 = vmov 0.0   ;;  %vm305_vm1 = vmmov 0   ;;  %s428_s0 = inlined_call_operand.vmem [shape: f32[8,128], index: 0, kind: input, shape index: {}]   ;;  %s429_s1 = inlined_call_operand.vmem [shape: f32[8,128], index: 1, kind: input, shape index: {}]   ;;  %s430_s2 = inlined_call_operand.vmem [shape: f32[128,128], index: 2, kind: input, shape index: {}]   ;;  %s431_s3 = inlined_call_operand.vmem [shape: f32[1,128], index: 3, kind: input, shape index: {}]   ;;  %s432_s4 = inlined_call_operand.vmem [shape: f32[8,1], index: 4, kind: input, shape index: {}]   ;;  %s433_s5 = inlined_call_operand.hbm [shape: f32[1,1], index: 5, kind: output, shape index: {}]  }
   0x1   :  { %v25_v0 = vld [vmem:[%s428_s0] sm:$0xff]  ;;  %v50_v1 = vld [vmem:[%s430_s2 + $0x78] sm:$0xff]  ;;  %232 = vmatprep.subr.mxu0 %v304_v3  ;;  %v49_v4 = vld [vmem:[%s430_s2 + $0x70] sm:$0xff]  ;;  %264 = vmatprep.mubr.msk.f32.mxu0 %vm305_vm1, %v304_v3  ;;  %31 = vst.msk [vmem:[#allocation3] sm:$0xff] %vm29_vm0, %v304_v3 }
   0x2   :  { %v26_v2 = vmul.f32 %v25_v0, %v25_v0  ;;  %32 = vst.msk [vmem:[#allocation4] sm:$0xff] %vm29_vm0, %v304_v3  ;;  %233 = vmatpush3.msra.mxu0 %v50_v1  ;;  %v48_v5 = vld [vmem:[%s430_s2 + $0x68] sm:$0xff]  ;;  %v47_v6 = vld [vmem:[%s430_s2 + $0x60] sm:$0xff] }
   0x3   :  { %234 = vmatprep.subr.mxu0 %v304_v3 }
   0x4   :  { %27 = vadd.xlane.f32.xlu0 %v26_v2  ;;  %235 = vmatpush3.msra.mxu0 %v49_v4 }
   0x5   :  { %236 = vmatprep.subr.mxu0 %v304_v3 }
   0x6   :  { %10 = vsyncpa [#allocation6], 0  ;;  %237 = vmatpush3.msra.mxu0 %v48_v5  ;;  %v46_v7 = vld [vmem:[%s430_s2 + $0x58] sm:$0xff]  ;;  %v45_v8 = vld [vmem:[%s430_s2 + $0x50] sm:$0xff]  ;;  %v306_v11 = vmov 0   ;;  %s307_s30 = smov [#allocation5]  }
   0x7   :  { %238 = vmatprep.subr.mxu0 %v304_v3  ;;  %v44_v9 = vld [vmem:[%s430_s2 + $0x48] sm:$0xff]  ;;  %v43_v10 = vld [vmem:[%s430_s2 + $0x40] sm:$0xff]  ;;  %277 = vset.pattern.permute.xlu0 %v306_v11  ;;  %v42_v12 = vld [vmem:[%s430_s2 + $0x38] sm:$0xff]  ;;  %s205_s6 = sshll.u32 %s307_s30, 4  ;;  %vm197_vm5 = vcmask 0   ;;  %s206_s6 = int_to_ptr.vmem [resolvable:$true] %s205_s6 }
   0x8   :  { %239 = vmatpush3.msra.mxu0 %v47_v6  ;;  %v41_v13 = vld [vmem:[%s430_s2 + $0x30] sm:$0xff]  ;;  %v40_v14 = vld [vmem:[%s430_s2 + $0x28] sm:$0xff]  ;;  %v39_v15 = vld [vmem:[%s430_s2 + $0x20] sm:$0xff]  ;;  %s282_s9 = scalar_lea.vmem %s206_s6, 16  ;;  %s286_s10 = scalar_lea.vmem %s206_s6, 32 }
   0x9   :  { %240 = vmatprep.subr.mxu0 %v304_v3  ;;  %v38_v16 = vld [vmem:[%s430_s2 + $0x18] sm:$0xff]  ;;  %v37_v17 = vld [vmem:[%s430_s2 + $0x10] sm:$0xff]  ;;  %v36_v18 = vld [vmem:[%s430_s2 + $0x8] sm:$0xff]  ;;  %p283_p0 = scmp.ne.s32.totalorder %s206_s6, %s282_s9  ;;  %p287_p1 = scmp.lt.s32.totalorder %s206_s6, %s206_s6 }
   0xa   :  { %241 = vmatpush3.msra.mxu0 %v46_v7  ;;  %v35_v19 = vld [vmem:[%s430_s2] sm:$0xff]  ;;  %v146_v38 = vld [vmem:[#allocation3] sm:$0xff]  ;;  %v152_v41 = vld [vmem:[#allocation4] sm:$0xff]  ;;  %p288_p2 = scmp.lt.s32.totalorder %s286_s10, %s282_s9 }
   0xb   :  { %242 = vmatprep.subr.mxu0 %v304_v3  ;;  %v213_v24 = vld [vmem:[%s431_s3] ss:$0 sm:$0xff] }
   0xc   :  { %243 = vmatpush3.msra.mxu0 %v45_v8  ;;  %v33_v32 = vld [vmem:[%s429_s1] sm:$0xff]  ;;  %p289_p3 = por %p288_p2, %p287_p1 }
   0xd   :  { %244 = vmatprep.subr.mxu0 %v304_v3  ;;  %v161_v44 = vld [vmem:[%s432_s4] sm:$0xff] }
   0xe   :  { %245 = vmatpush3.msra.mxu0 %v44_v9  ;;  %p290_p4 = pnand %p289_p3, %p283_p0 }
   0xf   :  { %246 = vmatprep.subr.mxu0 %v304_v3 }
  0x10   :  { %247 = vmatpush3.msra.mxu0 %v43_v10 }
  0x11   :  { %248 = vmatprep.subr.mxu0 %v304_v3 }
  0x12   :  { %249 = vmatpush3.msra.mxu0 %v42_v12 }
  0x13   :  { %250 = vmatprep.subr.mxu0 %v304_v3 }
  0x14   :  { %251 = vmatpush3.msra.mxu0 %v41_v13 }
  0x15   :  { %252 = vmatprep.subr.mxu0 %v304_v3 }
  0x16   :  { %253 = vmatpush3.msra.mxu0 %v40_v14 }
  0x17   :  { %254 = vmatprep.subr.mxu0 %v304_v3 }
  0x18   :  { %255 = vmatpush3.msra.mxu0 %v39_v15 }
  0x19   :  { %256 = vmatprep.subr.mxu0 %v304_v3 }
  0x1a   :  { %257 = vmatpush3.msra.mxu0 %v38_v16 }
  0x1b   :  { %258 = vmatprep.subr.mxu0 %v304_v3 }
  0x1c   :  { %259 = vmatpush3.msra.mxu0 %v37_v17 }
  0x1d   :  { %260 = vmatprep.subr.mxu0 %v304_v3 }
  0x1e   :  { %261 = vmatpush3.msra.mxu0 %v36_v18 }
  0x1f   :  { %262 = vmatprep.subr.mxu0 %v304_v3 }
  0x20   :  { %263 = vmatpush3.msra.mxu0 %v35_v19 }
  0x21   :  { %265 = vmatmul.mubr.f32.vlgmr.msra.gmra.mxu0 %v25_v0 }
  0x8d   :  { %v28_v20 = vpop.xlane.xlu0 %27 }
  0x8e   :  { %30 = vst.msk [vmem:[#allocation2] sm:$0xff] %vm29_vm0, %v28_v20 }
  0x95   :  { %v121_v21 = vld [vmem:[#allocation2] sm:$0xff] }
  0x96   :  { %125 = vperm.xlu0 %277, %v121_v21  }
  0xe1   :  { %v117_v22 = vpop.f32.mrf.mxu0 }
  0xe2   :  { %v135_v25 = vmul.f32 2.0, %v117_v22 }
  0xe3   :  { %v266_v23 = vpop.f32.mrf.mxu0 }
 0x111   :  { %v126_v26 = vpop.permute.xlu0 %125 }
 0x112   :  { %v134_v27 = vadd.f32 %v213_v24, %v126_v26 }
 0x114   :  { %v136_v28 = vsub.f32 %v134_v27, %v135_v25 }
 0x116   :  { %v137_v29 = vmax.f32 %v136_v28, 0.0 }
 0x118   :  { %278 = vrsqrt.f32 %v137_v29  ;;  %vm140_vm2 = vcmp.eq.f32.partialorder %v137_v29, inf  ;;  %v143_v33 = vand.u32 2147483648, %v137_v29  ;;  %vm142_vm3 = vcmp.eq.f32.partialorder %v137_v29, 0.0 }
 0x125   :  { %v279_v30 = vpop.eup %278 }
 0x126   :  { %v139_v31 = vmul.f32 %v279_v30, %v137_v29 }
 0x128   :  { %v141_v34 = vsel %vm140_vm2, %v137_v29, %v139_v31 }
 0x129   :  { %v144_v35 = vsel %vm142_vm3, %v143_v33, %v141_v34 }
 0x12a   :  { %v145_v36 = vmul.f32 %v144_v35, %v33_v32 }
 0x12c   :  { %147 = vadd.xlane.f32.xlu1 %v145_v36  ;;  %v153_v37 = vmul.f32 %v145_v36, %v144_v35 }
 0x130   :  { %154 = vadd.xlane.f32.xlu1 %v153_v37 }
 0x1b5   :  { %v148_v39 = vpop.xlane.xlu1 %147 }
 0x1b6   :  { %v149_v40 = vadd.f32 %v148_v39, %v146_v38 }
 0x1b8   :  { %151 = vst.msk [vmem:[#allocation3] sm:$0xff] %vm29_vm0, %v149_v40 }
 0x1b9   :  { %v155_v42 = vpop.xlane.xlu1 %154 }
 0x1ba   :  { %v156_v43 = vadd.f32 %v155_v42, %v152_v41 }
 0x1bc   :  { %157 = vst.msk [vmem:[#allocation4] sm:$0xff] %vm29_vm0, %v156_v43 }
 0x1bf   :  { %v162_v45 = vld [vmem:[#allocation3] sm:$0xff] }
 0x1c0   :  { %v163_v46 = vmul.f32 %v162_v45, %v161_v44 }
 0x1c2   :  { %v166_v49 = vmul.f32 %v163_v46, %v163_v46 }
 0x1c3   :  { %v164_v47 = vld [vmem:[#allocation4] sm:$0xff] }
 0x1c4   :  { %v165_v48 = vmul.f32 %v164_v47, %v161_v44 }
 0x1c6   :  { %v167_v50 = vsub.f32 %v165_v48, %v166_v49 }
 0x1c8   :  { %vm168_vm4 = vcmp.ne.f32.partialorder %v167_v50, 0.0  ;;  %v182_v53 = vsel %vm29_vm0, %v167_v50, 0.0 }
 0x1c9   :  { %v214_v51 = vsel %vm168_vm4, 1.0, %v304_v3 }
 0x1ca   :  { %v171_v52 = vsel %vm29_vm0, %v214_v51, 0.0 }
 0x1cb   :  { %172 = vadd.xlane.f32.xlu1 %v171_v52 }
 0x1cf   :  { %183 = vadd.xlane.f32.xlu1 %v182_v53 }
 0x254   :  { %v173_v54 = vpop.xlane.xlu1 %172 }
 0x255   :  { %v174_v55 = vrot.slane %v173_v54, 4 }
 0x257   :  { %v175_v56 = vadd.f32 %v174_v55, %v173_v54 }
 0x258   :  { %v184_v57 = vpop.xlane.xlu1 %183 }
 0x259   :  { %v176_v58 = vrot.slane %v175_v56, 2  ;;  %v185_v59 = vrot.slane %v184_v57, 4 }
 0x25b   :  { %v186_v60 = vadd.f32 %v185_v59, %v184_v57  ;;  %v177_v61 = vadd.f32 %v176_v58, %v175_v56 }
 0x25d   :  { %v187_v62 = vrot.slane %v186_v60, 2  ;;  %v178_v63 = vrot.slane %v177_v61, 1 }
 0x25f   :  { %v188_v0 = vadd.f32 %v187_v62, %v186_v60  ;;  %v179_v1 = vadd.f32 %v178_v63, %v177_v61 }
 0x261   :  { %267 = vpush %v179_v1  ;;  %v189_v2 = vrot.slane %v188_v0, 1 }
 0x263   :  { %v190_v3 = vadd.f32 %v189_v2, %v188_v0 }
 0x265   :  { %269 = vpush %v190_v3 }
 0x292   :  { %s268_s4 = spop %267 }
 0x293   :  { %s181_s28 = sadd.f32 0.0001, %s268_s4 }
 0x295   :  { %v192_v4 = vstv %s181_s28 }
 0x296   :  { %280 = vrcp.f32 %v192_v4  ;;  %s270_s29 = spop %269 }
 0x2a3   :  { %v281_v5 = vpop.eup %280 }
 0x2a4   :  { %271 = vpush %v281_v5 }
 0x2d5   :  { %s272_s7 = spop %271 }
 0x2d6   :  { %s195_s8 = smul.f32 %s272_s7, %s270_s29 }
 0x2d8   :  { %v196_v6 = vstv %s195_s8 }
 0x2d9   :  { %198 = vst.msk [vmem:[#allocation5] sm:$0x1] %vm197_vm5, %v196_v6 }
 0x2da   :  { %293 = shalt.err (!%p290_p4)
}
 0x2db   :  { %208 = dma.vmem_to_hbm [thread:$0]  %s206_s6, 16, %s433_s5, [#allocation6]  }
 0x2dc   :  { %302 = dma.done.wait [#allocation6], 16  }
 0x2dd   :  { %303 = vsyncadd [#allocation6], 4294967280 }
 0x2de   :  { %212 = vsyncpa [#allocation6], 1 }

</bundles_post_ra>
